<compile_context>
chip_gen: v7x
topology: tpu7x:2x2x1
jax: 0.10.0
libtpu: 0.0.40
codegen_flags: <defaults>
</compile_context>

<pallas_src>
import jax
import jax.numpy as jnp
from jax.experimental import pallas as pl
from jax.experimental.pallas import tpu as pltpu


def _copy_kernel(x_ref, o_ref):
    # Copy the current lane-dense tile verbatim.
    o_ref[...] = x_ref[...]


def _vmem_capacity_bytes():
    """Physical per-core VMEM; conservative fallback if query is unavailable."""
    try:
        return int(pltpu.get_tpu_info().vmem_capacity_bytes)
    except Exception:
        return 64 << 20  # v7x per-TC VMEM (smallest current generation)


def _sublane_multiple(itemsize):
    # Native sublane packing: f32 -> 8, bf16/f16 -> 16, int8/fp8 -> 32.
    return max(8, 32 // int(itemsize))


def _pick_lane(total):
    for cand in (16384, 8192, 4096, 2048, 1024, 512, 256, 128):
        if total % cand == 0:
            return cand
    return 0


def _pick_tile_rows(rows, lane, itemsize, sub, target_block_bytes, want_multi_block):
    if rows <= sub:
        return rows  # full sublane dim -> always a legal block shape
    max_by_bytes = max(sub, (target_block_bytes // (lane * itemsize)) // sub * sub)
    tile = min((rows // sub) * sub, max_by_bytes)
    if want_multi_block:
        # Cap so the grid has >= 2 blocks (lets v7x shard across both TCs).
        half = max(sub, ((rows // 2) // sub) * sub)
        tile = min(tile, half)
    # Prefer an exact divisor of rows so every block / DMA / store is full-size.
    t = tile
    while t >= sub:
        if rows % t == 0:
            return t
        t -= sub
    return tile  # ragged last block handled by Pallas boundary masking


def _tiled_copy_2d(x2, tile_rows, vmem_limit_bytes):
    rows, lane = x2.shape
    itemsize = jnp.dtype(x2.dtype).itemsize
    grid = (pl.cdiv(rows, tile_rows),)
    return pl.pallas_call(
        _copy_kernel,
        out_shape=jax.ShapeDtypeStruct((rows, lane), x2.dtype),
        grid=grid,
        in_specs=[pl.BlockSpec((tile_rows, lane), lambda i: (i, 0))],
        out_specs=pl.BlockSpec((tile_rows, lane), lambda i: (i, 0)),
        compiler_params=pltpu.CompilerParams(
            dimension_semantics=("parallel",),
            vmem_limit_bytes=int(vmem_limit_bytes),
        ),
        cost_estimate=pl.CostEstimate(
            flops=0,
            transcendentals=0,
            bytes_accessed=2 * rows * lane * itemsize,
        ),
    )(x2)


def pallas_identity_copy(x, *, target_block_bytes=None, alias_output=False):
    """Materialize a copy of `x` through a tiled, lane-dense Pallas kernel.

    `alias_output=True` means the caller would donate `x` and accept the same
    buffer back; that is semantically identical to `x`, so we move zero bytes.
    """
    if alias_output:
        return x

    orig_shape = x.shape
    total = int(x.size)
    if total == 0:
        return x

    itemsize = jnp.dtype(x.dtype).itemsize
    sub = _sublane_multiple(itemsize)

    vmem_cap = _vmem_capacity_bytes()
    if target_block_bytes is None:
        # Big-VMEM chips (v5e/v6e: 128 MiB) -> 8 MiB tiles; v7x (64 MiB) -> 4 MiB.
        target_block_bytes = (8 << 20) if vmem_cap >= (100 << 20) else (4 << 20)

    lane = _pick_lane(total)

    if lane == 0:
        # Element count is not a multiple of 128: copy the lane-dense body with
        # the tiled kernel and the (<128-element) tail outside it.
        flat = x.reshape(total)
        body_elems = (total // 128) * 128
        if body_elems == 0:
            # Tiny array: single full block (block shape == full array dims).
            out = pl.pallas_call(
                _copy_kernel,
                out_shape=jax.ShapeDtypeStruct((1, total), x.dtype),
            )(flat.reshape(1, total))
            return out.reshape(orig_shape)
        body = pallas_identity_copy(
            flat[:body_elems], target_block_bytes=target_block_bytes
        )
        out = jnp.concatenate([body.reshape(body_elems), flat[body_elems:]])
        return out.reshape(orig_shape)

    rows = total // lane
    x2 = x.reshape(rows, lane)

    total_bytes = total * itemsize
    want_multi_block = total_bytes > (8 << 20)
    tile_rows = _pick_tile_rows(
        rows, lane, itemsize, sub, target_block_bytes, want_multi_block
    )

    tile_bytes = tile_rows * lane * itemsize
    # Footprint ~= 2 refs (in + out) x 2 buffers x tile, plus headroom; cap at
    # half the physical per-core VMEM so compiler scratch / neighbors still fit.
    vmem_limit = min(4 * tile_bytes + (8 << 20), vmem_cap // 2)

    out = _tiled_copy_2d(x2, tile_rows, vmem_limit)
    return out.reshape(orig_shape)


def stormcast_diffusion_forward(x, noise, class_labels=None, condition=None):
    """Pallas/JAX equivalent of PhooStormCastDiffusionModel.forward.

    The reference forward returns `x` unchanged; the fastest correct
    implementation moves zero bytes.  Use `pallas_identity_copy(x)` only when
    a freshly materialized output buffer is explicitly required.
    """
    del noise, class_labels, condition  # unused by the reference forward
    return x


def round_sigma(sigma):
    """Equivalent of PhooStormCastDiffusionModel.round_sigma."""
    return jnp.asarray(sigma)


# Module "parameters": the reference module has no learnable weights, only two
# scalar attributes, reproduced here.
SIGMA_MIN = 0.0
SIGMA_MAX = 88.0


if __name__ == "__main__":
    key = jax.random.PRNGKey(0)
    kx, kn, kb, kt = jax.random.split(key, 4)

    # Shapes consistent with the forward signature: NCHW image + noise.
    x = jax.random.normal(kx, (2, 4, 16, 16), dtype=jnp.float32)
    noise = jax.random.normal(kn, (2, 4, 16, 16), dtype=jnp.float32)

    # Fast path: identity (zero HBM traffic) -- matches reference semantics.
    y = stormcast_diffusion_forward(x, noise)
    y = jax.block_until_ready(y)
    assert y.shape == x.shape and y.dtype == x.dtype
    assert bool(jnp.all(y == x))

    # Aliased path now also skips the kernel (zero bytes moved).
    ya = jax.block_until_ready(pallas_identity_copy(x, alias_output=True))
    assert bool(jnp.all(ya == x))

    # Pallas copy path: lane-dense tiled copy (single block at this size).
    y2 = jax.block_until_ready(jax.jit(pallas_identity_copy)(x))
    assert y2.shape == x.shape and y2.dtype == x.dtype
    assert bool(jnp.all(y2 == x))

    # Multi-block path: small target block forces grid >= 2 (divisor tile).
    xb = jax.random.normal(kb, (256, 1024), dtype=jnp.float32)
    y3 = jax.block_until_ready(
        jax.jit(lambda a: pallas_identity_copy(a, target_block_bytes=64 << 10))(xb)
    )
    assert bool(jnp.all(y3 == xb))

    # Non-128-multiple element counts: body+tail split and tiny single block.
    xt = jax.random.normal(kt, (5, 100), dtype=jnp.float32)   # 500 elems
    y4 = jax.block_until_ready(jax.jit(pallas_identity_copy)(xt))
    assert bool(jnp.all(y4 == xt))
    xs = jnp.arange(105, dtype=jnp.float32).reshape(3, 5, 7)  # 105 elems
    y5 = jax.block_until_ready(jax.jit(pallas_identity_copy)(xs))
    assert bool(jnp.all(y5 == xs))

    # round_sigma parity check.
    s = round_sigma(1.5)
    assert float(s) == 1.5

    print("KERNEL_OK")
</pallas_src>

<mosaic_0001>
module attributes {stable_mosaic.version = 11 : i64} {
  func.func @_copy_kernel(%arg0: i32, %arg1: memref<1x2048xf32, #tpu.memory_space<vmem>>, %arg2: memref<1x2048xf32, #tpu.memory_space<vmem>>) attributes {dimension_semantics = [#tpu.dimension_semantics<parallel>], iteration_bounds = array<i64: 1>, scalar_prefetch = 0 : i64, scratch_operands = 0 : i64, tpu.core_type = #tpu.core_type<tc>, window_params = [{transform_indices = @transform_0, window_bounds = array<i64: 1, 2048>}, {transform_indices = @transform_1, window_bounds = array<i64: 1, 2048>}]} {
    %c0 = arith.constant 0 : index
    %c0_0 = arith.constant 0 : index
    %0 = vector.load %arg1[%c0, %c0_0] : memref<1x2048xf32, #tpu.memory_space<vmem>>, vector<1x2048xf32>
    %c0_1 = arith.constant 0 : index
    %c0_2 = arith.constant 0 : index
    %1 = vector.load %arg2[%c0_1, %c0_2] : memref<1x2048xf32, #tpu.memory_space<vmem>>, vector<1x2048xf32>
    tpu.vector_store %arg2[%c0_1, %c0_2], %0 {strides = array<i32>} : memref<1x2048xf32, #tpu.memory_space<vmem>>, vector<1x2048xf32>,
    return
  }
  func.func @transform_0(%arg0: i32) -> (i32, i32) {
    %c0_i32 = arith.constant 0 : i32
    %c0_i32_0 = arith.constant 0 : i32
    return %arg0, %c0_i32 : i32, i32
  }
  func.func @transform_1(%arg0: i32) -> (i32, i32) {
    %c0_i32 = arith.constant 0 : i32
    %c0_i32_0 = arith.constant 0 : i32
    return %arg0, %c0_i32 : i32, i32
  }
}

</mosaic_0001>

<bundles_post_ra>
// kernel: pallas_identity_copy.1
= control target key start
LH: loop header
LB: loop body
LE: loop exit
PB: predicated region body
PF: predicated region fallthrough
CT: control target
= control target key end

     0   :  { %s38_s0 = inlined_call_operand.vmem [shape: f32[1,2048], index: 0, kind: input, shape index: {}]   ;;  %s39_s1 = inlined_call_operand.vmem [shape: f32[1,2048], index: 1, kind: output, shape index: {}]  }
   0x1   :  { %v8_v0 = vld [vmem:[%s38_s0] sm:$0xff]  ;;  %v9_v1 = vld [vmem:[%s38_s0 + $0x8] sm:$0xff] }
   0x2   :  { %10 = vst [vmem:[%s39_s1] sm:$0xff] %v8_v0  ;;  %11 = vst [vmem:[%s39_s1 + $0x8] sm:$0xff] %v9_v1 }

</bundles_post_ra>
